<compile_context>
chip_gen: v5e
topology: v5e:2x2
jax: 0.10.0
libtpu: 0.0.40
codegen_flags: <defaults>
</compile_context>

<pallas_src>
import functools

import jax
import jax.numpy as jnp
from jax.experimental import pallas as pl
from jax.experimental.pallas import tpu as pltpu

SUBLANES = 8
# Lane widths tried in order of preference (lane-dense first).
_WIDTH_CANDIDATES = (1024, 512, 256, 128)
# Target ~2 MiB (f32) blocks: big enough to hit ~85% of HBM roofline, small
# enough that in+out double-buffered footprint stays well under the 16 MiB
# v5e scoped-VMEM default (and v7x's 32 MiB / 64 MiB-per-TC budget).
_TARGET_BLOCK_BYTES = 2 * 1024 * 1024


def _pick_layout(n):
    """Pick (lane_width, pad) for a flat array of n elements."""
    for w in _WIDTH_CANDIDATES:
        if n % (SUBLANES * w) == 0:
            return w, 0
    # Ragged size: pad up to a multiple of 8 * 512 (pad/slice only fire here).
    w = 512
    pad = (-n) % (SUBLANES * w)
    return w, pad


def _binarize_kernel(threshold, x_ref, o_ref):
    # threshold is a static Python float (baked in); comparison happens in the
    # input's native dtype, output is float32 (matches torch `.float()`).
    o_ref[...] = (x_ref[...] > threshold).astype(jnp.float32)


def _binarize_2d(x2d, threshold):
    rows, width = x2d.shape
    # rows is a multiple of 8 and width a multiple of 128 by construction.
    bytes_per_row = width * 4  # f32 output is the wider of in/out
    row_tile = max(SUBLANES,
                   (_TARGET_BLOCK_BYTES // bytes_per_row) // SUBLANES * SUBLANES)
    row_tile = min(row_tile, rows)
    grid = (pl.cdiv(rows, row_tile),)

    kernel = functools.partial(_binarize_kernel, float(threshold))
    return pl.pallas_call(
        kernel,
        out_shape=jax.ShapeDtypeStruct((rows, width), jnp.float32),
        grid=grid,
        in_specs=[pl.BlockSpec((row_tile, width), lambda i: (i, 0))],
        out_specs=pl.BlockSpec((row_tile, width), lambda i: (i, 0)),
        compiler_params=pltpu.CompilerParams(
            dimension_semantics=("parallel",),  # shard grid across TCs (v7x)
        ),
    )(x2d)


def _binarize_impl(x, threshold):
    orig_shape = x.shape
    n = x.size
    if n == 0:
        return jnp.zeros(orig_shape, jnp.float32)
    flat = jnp.ravel(x)  # native dtype, no cast
    width, pad = _pick_layout(n)
    if pad:
        flat = jnp.pad(flat, (0, pad))
    x2d = flat.reshape(-1, width)
    out2d = _binarize_2d(x2d, threshold)
    out_flat = out2d.reshape(-1)
    if pad:
        out_flat = out_flat[:n]
    return out_flat.reshape(orig_shape)


# TODO(synk): threshold is a static (non-traced) Python float via
# nondiff_argnums; a traced/learned threshold would need a scalar-prefetch path.
@functools.partial(jax.custom_vjp, nondiff_argnums=(1,))
def hinton_binarize(x, threshold=0.5):
    """(x > threshold).float() with unit (straight-through) gradient."""
    return _binarize_impl(x, threshold)


def _fwd(x, threshold):
    # Residual carries only x's dtype (zero-size array) for the backward cast.
    return _binarize_impl(x, threshold), jnp.zeros((0,), x.dtype)


def _bwd(threshold, res, g):
    # Unit gradient w.r.t. x; cast cotangent back to x's dtype.
    return (g.astype(res.dtype),)


hinton_binarize.defvjp(_fwd, _bwd)


class HintonBinarizer:
    def __init__(self, threshold=0.5):
        self.threshold = threshold

    def __call__(self, x, threshold=None):
        threshold = threshold if threshold is not None else self.threshold
        return hinton_binarize(x, threshold)


if __name__ == "__main__":
    key = jax.random.PRNGKey(0)
    # NCHW input, consistent with a conv-style feature map
    x = jax.random.uniform(key, (2, 4, 16, 16), dtype=jnp.float32)

    binarizer = HintonBinarizer(threshold=0.5)
    out = binarizer(x)
    jax.block_until_ready(out)

    # correctness vs plain JAX reference
    ref = (x > 0.5).astype(jnp.float32)
    assert out.shape == x.shape and out.dtype == jnp.float32
    assert bool(jnp.all(out == ref))

    # straight-through gradient: d sum(Binarize(x)) / dx == 1
    g = jax.grad(lambda v: jnp.sum(hinton_binarize(v, 0.5)))(x)
    jax.block_until_ready(g)
    assert g.dtype == x.dtype and bool(jnp.all(g == 1.0))

    # native-dtype path: bf16 input -> f32 output, bf16 unit gradient
    xb = x.astype(jnp.bfloat16)
    outb = binarizer(xb)
    jax.block_until_ready(outb)
    assert outb.dtype == jnp.float32
    assert bool(jnp.all(outb == (xb > 0.5).astype(jnp.float32)))
    gb = jax.grad(lambda v: jnp.sum(hinton_binarize(v, 0.5)))(xb)
    jax.block_until_ready(gb)
    assert gb.dtype == jnp.bfloat16 and bool(jnp.all(gb == 1.0))

    print("KERNEL_OK")
</pallas_src>

<mosaic_0001>
module attributes {stable_mosaic.version = 11 : i64} {
  func.func @_binarize_kernel(%arg0: i32, %arg1: memref<8x256xf32, #tpu.memory_space<vmem>>, %arg2: memref<8x256xf32, #tpu.memory_space<vmem>>) attributes {dimension_semantics = [#tpu.dimension_semantics<parallel>], iteration_bounds = array<i64: 1>, scalar_prefetch = 0 : i64, scratch_operands = 0 : i64, tpu.core_type = #tpu.core_type<tc>, window_params = [{transform_indices = @transform_0, window_bounds = array<i64: 8, 256>}, {transform_indices = @transform_1, window_bounds = array<i64: 8, 256>}]} {
    %c0 = arith.constant 0 : index
    %c0_0 = arith.constant 0 : index
    %0 = vector.load %arg1[%c0, %c0_0] : memref<8x256xf32, #tpu.memory_space<vmem>>, vector<8x256xf32>
    %cst = arith.constant 5.000000e-01 : f32
    %1 = vector.broadcast %cst : f32 to vector<8x256xf32>
    %2 = arith.cmpf ogt, %0, %1 : vector<8x256xf32>
    %3 = arith.extui %2 : vector<8x256xi1> to vector<8x256xi32>
    %4 = arith.sitofp %3 : vector<8x256xi32> to vector<8x256xf32>
    %c0_1 = arith.constant 0 : index
    %c0_2 = arith.constant 0 : index
    %5 = vector.load %arg2[%c0_1, %c0_2] : memref<8x256xf32, #tpu.memory_space<vmem>>, vector<8x256xf32>
    tpu.vector_store %arg2[%c0_1, %c0_2], %4 {strides = array<i32>} : memref<8x256xf32, #tpu.memory_space<vmem>>, vector<8x256xf32>,
    return
  }
  func.func @transform_0(%arg0: i32) -> (i32, i32) {
    %c0_i32 = arith.constant 0 : i32
    %c0_i32_0 = arith.constant 0 : i32
    return %arg0, %c0_i32 : i32, i32
  }
  func.func @transform_1(%arg0: i32) -> (i32, i32) {
    %c0_i32 = arith.constant 0 : i32
    %c0_i32_0 = arith.constant 0 : i32
    return %arg0, %c0_i32 : i32, i32
  }
}

</mosaic_0001>

<bundles_post_ra>
// kernel: tpu_custom_call.1
= control target key start
LH: loop header
LB: loop body
LE: loop exit
PB: predicated region body
PF: predicated region fallthrough
CT: control target
= control target key end

     0   :  { %6 = vsyncpa [#allocation3], 0  ;;  %s126_s0 = inlined_call_operand.hbm [shape: f32[8,256], index: 0, kind: input, shape index: {}]   ;;  %s127_s1 = inlined_call_operand.hbm [shape: f32[8,256], index: 1, kind: output, shape index: {}]  }
   0x1   :  { %7 = vsyncpa [#allocation4], 0  ;;  %s13_s8 = sshll.u32 %s126_s0, 4  ;;  %s107_s9 = smov [#allocation2]   ;;  %s14_s8 = int_to_ptr.hbm [resolvable:$true] %s13_s8 }
   0x2   :  { %s15_s10 = sshll.u32 %s107_s9, 4  ;;  %s16_s10 = int_to_ptr.vmem [resolvable:$true] %s15_s10 }
   0x3   :  { %18 = dma.hbm_to_vmem [thread:$0]  %s14_s8, 256, %s16_s10, [#allocation3]  }
   0x4   :  { %103 = dma.done.wait [#allocation3], 256  }
   0x5   :  { %104 = vsyncadd [#allocation3], 4294967040  ;;  %s108_s11 = smov [#allocation5]   ;;  %s40_s15 = sshll.u32 %s127_s1, 4  ;;  %v23_v0 = vld [vmem:[#allocation2] sm:$0xff]  ;;  %v24_v1 = vld [vmem:[#allocation2 + $0x8] sm:$0xff]  ;;  %s41_s15 = int_to_ptr.hbm [resolvable:$true] %s40_s15 }
   0x6   :  { %s38_s12 = sshll.u32 %s108_s11, 4  ;;  %vm25_vm0 = vcmp.gt.f32.partialorder %v23_v0, 0.5  ;;  %vm26_vm1 = vcmp.gt.f32.partialorder %v24_v1, 0.5  ;;  %v109_v2 = vmov 0.0   ;;  %s39_s12 = int_to_ptr.vmem [resolvable:$true] %s38_s12 }
   0x7   :  { %v50_v3 = vsel %vm25_vm0, 1.0, %v109_v2  ;;  %v51_v4 = vsel %vm26_vm1, 1.0, %v109_v2 }
   0x8   :  { %31 = vst [vmem:[#allocation5] sm:$0xff] %v50_v3 }
   0x9   :  { %32 = vst [vmem:[#allocation5 + $0x8] sm:$0xff] %v51_v4 }
   0xa   :  { %43 = dma.vmem_to_hbm [thread:$0]  %s39_s12, 256, %s41_s15, [#allocation4]  }
   0xb   :  { %105 = dma.done.wait [#allocation4], 256  }
   0xc   :  { %106 = vsyncadd [#allocation4], 4294967040 }
   0xd   :  { %48 = vsyncpa [#allocation3], 1 }
   0xe   :  { %49 = vsyncpa [#allocation4], 1 }

</bundles_post_ra>
